<compile_context>
chip_gen: v7x
topology: tpu7x:2x2x1
jax: 0.10.0
libtpu: 0.0.40
codegen_flags: <defaults>
</compile_context>

<pallas_src>
import functools

import jax
import jax.numpy as jnp
from jax.experimental import pallas as pl
from jax.experimental.pallas import tpu as pltpu

LANE = 128
SUBLANE = 8


def _round_up(x, m):
    return ((x + m - 1) // m) * m


def distmult_kernel(h_ref, r_ref, t_ref, o_ref):
    # h_ref / r_ref / t_ref: (TB, Dp) f32 slabs of gathered embeddings.
    # o_ref: (TB, 1) f32 scores for this block of triples.
    prod = h_ref[...] * r_ref[...] * t_ref[...]                 # VPU elementwise
    # Zero padding of the embedding dim (100 -> 128) is harmless for the sum.
    o_ref[...] = jnp.sum(prod, axis=-1, keepdims=True)


def pad_embedding_table(table):
    """Pad the embedding dim up to the 128-lane width. Call ONCE per table."""
    _, d = table.shape
    dp = _round_up(d, LANE)
    if dp == d:
        return table
    return jnp.pad(table, ((0, 0), (0, dp - d)))


@functools.partial(jax.jit, static_argnames=("tb",))
def distmult_forward(ent_p, rel_p, head, relation, tail, *, tb=256):
    """ent_p: (num_entities, Dp) f32 pre-padded entity table,
    rel_p: (num_relations, Dp) f32 pre-padded relation table,
    head / relation / tail: (B,) int32 index arrays.
    Returns (B,) f32 DistMult scores."""
    B = head.shape[0]
    Dp = ent_p.shape[1]

    # Triples per grid step: sublane-aligned, capped at `tb`.
    TB = min(tb, _round_up(B, SUBLANE))
    Bp = _round_up(B, TB)
    nblk = Bp // TB
    pad = Bp - B

    # Pad index vectors (index 0 is a valid row; padded scores are dropped).
    h_idx = jnp.pad(head, (0, pad))
    r_idx = jnp.pad(relation, (0, pad))
    t_idx = jnp.pad(tail, (0, pad))

    # Dense wrapper-side gather: (Bp, Dp) slabs streamed through the kernel.
    h_emb = jnp.take(ent_p, h_idx, axis=0, mode="clip")
    r_emb = jnp.take(rel_p, r_idx, axis=0, mode="clip")
    t_emb = jnp.take(ent_p, t_idx, axis=0, mode="clip")

    out = pl.pallas_call(
        distmult_kernel,
        out_shape=jax.ShapeDtypeStruct((Bp, 1), jnp.float32),
        grid_spec=pltpu.PrefetchScalarGridSpec(
            num_scalar_prefetch=0,
            grid=(nblk,),
            in_specs=[
                pl.BlockSpec((TB, Dp), lambda i: (i, 0)),
                pl.BlockSpec((TB, Dp), lambda i: (i, 0)),
                pl.BlockSpec((TB, Dp), lambda i: (i, 0)),
            ],
            out_specs=pl.BlockSpec((TB, 1), lambda i: (i, 0)),
        ),
        compiler_params=pltpu.CompilerParams(
            dimension_semantics=("parallel",)),
    )(h_emb, r_emb, t_emb)

    return out.reshape(Bp)[:B]


def xavier_uniform(key, shape):
    fan_in, fan_out = shape
    bound = jnp.sqrt(6.0 / (fan_in + fan_out))
    return jax.random.uniform(key, shape, jnp.float32, -bound, bound)


if __name__ == "__main__":
    # Small synthetic knowledge graph (no file reads): deterministic params.
    embedding_dim = 100
    num_entities = 64
    num_relations = 8
    batch = 300  # not a multiple of the tile -> exercises padding + 2 grid blocks

    k_ent, k_rel, k_h, k_r, k_t = jax.random.split(jax.random.PRNGKey(0), 5)
    entity_emb = xavier_uniform(k_ent, (num_entities, embedding_dim))
    relation_emb = xavier_uniform(k_rel, (num_relations, embedding_dim))

    head = jax.random.randint(k_h, (batch,), 0, num_entities, jnp.int32)
    relation = jax.random.randint(k_r, (batch,), 0, num_relations, jnp.int32)
    tail = jax.random.randint(k_t, (batch,), 0, num_entities, jnp.int32)

    # Pad tables to the lane width ONCE (hoisted out of the per-call path).
    ent_p = pad_embedding_table(entity_emb)
    rel_p = pad_embedding_table(relation_emb)

    scores = distmult_forward(ent_p, rel_p, head, relation, tail)
    scores = jax.block_until_ready(scores)

    # Pure-JAX reference check of DistMult semantics.
    ref = jnp.sum(entity_emb[head] * relation_emb[relation] * entity_emb[tail],
                  axis=1)
    assert scores.shape == (batch,)
    assert jnp.allclose(scores, ref, atol=1e-5, rtol=1e-5)

    print("KERNEL_OK")
</pallas_src>

<mosaic_0001>
module attributes {stable_mosaic.version = 11 : i64} {
  func.func @distmult_kernel(%arg0: i32, %arg1: memref<256x128xf32, #tpu.memory_space<vmem>>, %arg2: memref<256x128xf32, #tpu.memory_space<vmem>>, %arg3: memref<256x128xf32, #tpu.memory_space<vmem>>, %arg4: memref<256x1xf32, #tpu.memory_space<vmem>>) attributes {dimension_semantics = [#tpu.dimension_semantics<parallel>], iteration_bounds = array<i64: 2>, scalar_prefetch = 0 : i64, scratch_operands = 0 : i64, tpu.core_type = #tpu.core_type<tc>, window_params = [{transform_indices = @transform_0, window_bounds = array<i64: 256, 128>}, {transform_indices = @transform_1, window_bounds = array<i64: 256, 128>}, {transform_indices = @transform_2, window_bounds = array<i64: 256, 128>}, {transform_indices = @transform_3, window_bounds = array<i64: 256, 1>}]} {
    %c0 = arith.constant 0 : index
    %c0_0 = arith.constant 0 : index
    %0 = vector.load %arg1[%c0, %c0_0] : memref<256x128xf32, #tpu.memory_space<vmem>>, vector<256x128xf32>
    %c0_1 = arith.constant 0 : index
    %c0_2 = arith.constant 0 : index
    %1 = vector.load %arg2[%c0_1, %c0_2] : memref<256x128xf32, #tpu.memory_space<vmem>>, vector<256x128xf32>
    %2 = arith.mulf %0, %1 : vector<256x128xf32>
    %c0_3 = arith.constant 0 : index
    %c0_4 = arith.constant 0 : index
    %3 = vector.load %arg3[%c0_3, %c0_4] : memref<256x128xf32, #tpu.memory_space<vmem>>, vector<256x128xf32>
    %4 = arith.mulf %2, %3 : vector<256x128xf32>
    %cst = arith.constant dense<0.000000e+00> : vector<256xf32>
    %5 = vector.multi_reduction <add>, %4, %cst [1] : vector<256x128xf32> to vector<256xf32>
    %6 = vector.shape_cast %5 : vector<256xf32> to vector<256x1xf32>
    %c0_5 = arith.constant 0 : index
    %c0_6 = arith.constant 0 : index
    %7 = vector.load %arg4[%c0_5, %c0_6] : memref<256x1xf32, #tpu.memory_space<vmem>>, vector<256x1xf32>
    tpu.vector_store %arg4[%c0_5, %c0_6], %6 {strides = array<i32>} : memref<256x1xf32, #tpu.memory_space<vmem>>, vector<256x1xf32>,
    return
  }
  func.func @transform_0(%arg0: i32) -> (i32, i32) {
    %c0_i32 = arith.constant 0 : i32
    %c0_i32_0 = arith.constant 0 : i32
    return %arg0, %c0_i32 : i32, i32
  }
  func.func @transform_1(%arg0: i32) -> (i32, i32) {
    %c0_i32 = arith.constant 0 : i32
    %c0_i32_0 = arith.constant 0 : i32
    return %arg0, %c0_i32 : i32, i32
  }
  func.func @transform_2(%arg0: i32) -> (i32, i32) {
    %c0_i32 = arith.constant 0 : i32
    %c0_i32_0 = arith.constant 0 : i32
    return %arg0, %c0_i32 : i32, i32
  }
  func.func @transform_3(%arg0: i32) -> (i32, i32) {
    %c0_i32 = arith.constant 0 : i32
    %c0_i32_0 = arith.constant 0 : i32
    return %arg0, %c0_i32 : i32, i32
  }
}

</mosaic_0001>

<bundles_post_ra>
// kernel: distmult_forward.1
= control target key start
LH: loop header
LB: loop body
LE: loop exit
PB: predicated region body
PF: predicated region fallthrough
CT: control target
= control target key end

     0   :  { %s606_s12 = smov 0   ;;  %s803_s0 = inlined_call_operand.vmem [shape: f32[512,128], index: 0, kind: input, shape index: {}]   ;;  %s804_s1 = inlined_call_operand.vmem [shape: f32[512,128], index: 1, kind: input, shape index: {}]   ;;  %s805_s2 = inlined_call_operand.vmem [shape: f32[512,128], index: 2, kind: input, shape index: {}]   ;;  %s806_s3 = inlined_call_operand.vmem [shape: f32[512,1], index: 3, kind: output, shape index: {}]  }
   0x1 LB: > { %s555_s13 = sadd.s32 4294967295, %s584_s12   ;;  %p559_p0 = scmp.ge.s32.totalorder %s584_s12, 1  ;;  %s584_s12 = sphi %s606_s12, %s13_s12  }
   0x2   : > { %p160_p1 = scmp.lt.s32.totalorder %s584_s12, 3 }
   0x4   : > { %p161_p2 = pnand %p559_p0, %p160_p1 }
   0x5   : > { %s560_s14 = sshll.u32 (!%p161_p2), %s555_s13, 5  ;;  %vm442_vm0 = vcmask (!%p161_p2), 7168  }
   0x6   : > { %164 = sbr.rel (%p161_p2) target bundleno = 225 (0xe1), region = 32  ;;  %p195_p3 = scmp.lt.s32.totalorder (!%p161_p2), %s560_s14, 63 }
   0xd   : > { %s808_s14 = smov (!%p195_p3, %s560_s14), 63 }
   0xe   : > { %s614_s15 = sshll.u32 %s808_s14, 3 }
   0xf   : > { %s620_s18 = scalar_lea.vmem %s803_s0, %s614_s15  ;;  %s626_s21 = scalar_lea.vmem %s804_s1, %s614_s15 }
  0x10   : > { %s632_s24 = scalar_lea.vmem %s805_s2, %s614_s15  ;;  %v220_v0 = vld [vmem:[%s620_s18 + $0x10] sm:$0xff]  ;;  %v218_v2 = vld [vmem:[%s620_s18] sm:$0xff]  ;;  %v221_v8 = vld [vmem:[%s620_s18 + $0x18] sm:$0xff]  ;;  %s734_s27 = scalar_lea.vmem %s806_s3, %s614_s15 }
  0x11   : > { %v252_v1 = vld [vmem:[%s626_s21 + $0x10] sm:$0xff]  ;;  %v250_v5 = vld [vmem:[%s626_s21] sm:$0xff]  ;;  %v253_v9 = vld [vmem:[%s626_s21 + $0x18] sm:$0xff] }
  0x12   : > { %v284_v3 = vmul.f32 %v252_v1, %v220_v0  ;;  %v316_v4 = vld [vmem:[%s632_s24 + $0x10] sm:$0xff]  ;;  %v314_v6 = vld [vmem:[%s632_s24] sm:$0xff]  ;;  %v282_v7 = vmul.f32 %v250_v5, %v218_v2  ;;  %v317_v10 = vld [vmem:[%s632_s24 + $0x18] sm:$0xff]  ;;  %v285_v12 = vmul.f32 %v253_v9, %v221_v8 }
  0x13   : > { %v219_v13 = vld [vmem:[%s620_s18 + $0x8] sm:$0xff]  ;;  %v222_v22 = vld [vmem:[%s620_s18 + $0x20] sm:$0xff]  ;;  %v225_v27 = vld [vmem:[%s620_s18 + $0x38] sm:$0xff] }
  0x14   : > { %v348_v11 = vmul.f32 %v316_v4, %v284_v3  ;;  %v251_v14 = vld [vmem:[%s626_s21 + $0x8] sm:$0xff]  ;;  %v346_v16 = vmul.f32 %v314_v6, %v282_v7  ;;  %v349_v20 = vmul.f32 %v317_v10, %v285_v12  ;;  %v254_v23 = vld [vmem:[%s626_s21 + $0x20] sm:$0xff]  ;;  %v257_v28 = vld [vmem:[%s626_s21 + $0x38] sm:$0xff] }
  0x15   : > { %v315_v15 = vld [vmem:[%s632_s24 + $0x8] sm:$0xff]  ;;  %v283_v17 = vmul.f32 %v251_v14, %v219_v13  ;;  %v286_v26 = vmul.f32 %v254_v23, %v222_v22  ;;  %v318_v29 = vld [vmem:[%s632_s24 + $0x20] sm:$0xff]  ;;  %v224_v30 = vld [vmem:[%s620_s18 + $0x30] sm:$0xff]  ;;  %v289_v33 = vmul.f32 %v257_v28, %v225_v27 }
  0x16   : > { %v223_v18 = vld [vmem:[%s620_s18 + $0x28] sm:$0xff]  ;;  %382 = vadd.xlane.f32.xlu1 %v348_v11  ;;  %378 = vadd.xlane.f32.xlu0 %v346_v16  ;;  %v256_v31 = vld [vmem:[%s626_s21 + $0x30] sm:$0xff]  ;;  %v321_v35 = vld [vmem:[%s632_s24 + $0x38] sm:$0xff] }
  0x17   : > { %v255_v19 = vld [vmem:[%s626_s21 + $0x28] sm:$0xff]  ;;  %v347_v24 = vmul.f32 %v315_v15, %v283_v17  ;;  %v350_v34 = vmul.f32 %v318_v29, %v286_v26  ;;  %v288_v36 = vmul.f32 %v256_v31, %v224_v30  ;;  %v320_v39 = vld [vmem:[%s632_s24 + $0x30] sm:$0xff]  ;;  %v226_v40 = vld [vmem:[%s620_s18 + $0x40] sm:$0xff]  ;;  %v353_v42 = vmul.f32 %v321_v35, %v289_v33 }
  0x18   : > { %v287_v21 = vmul.f32 %v255_v19, %v223_v18  ;;  %v319_v25 = vld [vmem:[%s632_s24 + $0x28] sm:$0xff]  ;;  %v258_v41 = vld [vmem:[%s626_s21 + $0x40] sm:$0xff]  ;;  %v229_v47 = vld [vmem:[%s620_s18 + $0x58] sm:$0xff] }
  0x19   : > { %v227_v37 = vld [vmem:[%s620_s18 + $0x48] sm:$0xff]  ;;  %v352_v44 = vmul.f32 %v320_v39, %v288_v36  ;;  %v290_v46 = vmul.f32 %v258_v41, %v226_v40  ;;  %v261_v48 = vld [vmem:[%s626_s21 + $0x58] sm:$0xff]  ;;  %v322_v49 = vld [vmem:[%s632_s24 + $0x40] sm:$0xff] }
  0x1a   : > { %384 = vadd.xlane.f32.xlu1 %v349_v20  ;;  %v351_v32 = vmul.f32 %v319_v25, %v287_v21  ;;  %380 = vadd.xlane.f32.xlu0 %v347_v24  ;;  %v259_v38 = vld [vmem:[%s626_s21 + $0x48] sm:$0xff]  ;;  %v228_v50 = vld [vmem:[%s620_s18 + $0x50] sm:$0xff]  ;;  %v293_v53 = vmul.f32 %v261_v48, %v229_v47  ;;  %v325_v55 = vld [vmem:[%s632_s24 + $0x58] sm:$0xff] }
  0x1b   : > { %v291_v43 = vmul.f32 %v259_v38, %v227_v37  ;;  %v323_v45 = vld [vmem:[%s632_s24 + $0x48] sm:$0xff]  ;;  %v260_v51 = vld [vmem:[%s626_s21 + $0x50] sm:$0xff]  ;;  %v354_v54 = vmul.f32 %v322_v49, %v290_v46  ;;  %v230_v60 = vld [vmem:[%s620_s18 + $0x60] sm:$0xff] }
  0x1c   : > { %v292_v56 = vmul.f32 %v260_v51, %v228_v50  ;;  %v231_v57 = vld [vmem:[%s620_s18 + $0x68] sm:$0xff]  ;;  %v324_v59 = vld [vmem:[%s632_s24 + $0x50] sm:$0xff]  ;;  %v262_v61 = vld [vmem:[%s626_s21 + $0x60] sm:$0xff]  ;;  %v357_v62 = vmul.f32 %v325_v55, %v293_v53 }
  0x1d   : > { %v355_v52 = vmul.f32 %v323_v45, %v291_v43  ;;  %v263_v58 = vld [vmem:[%s626_s21 + $0x68] sm:$0xff]  ;;  %v294_v2 = vmul.f32 %v262_v61, %v230_v60  ;;  %v233_v3 = vld [vmem:[%s620_s18 + $0x78] sm:$0xff]  ;;  %v326_v5 = vld [vmem:[%s632_s24 + $0x60] sm:$0xff] }
  0x1e   : > { %388 = vadd.xlane.f32.xlu1 %v351_v32  ;;  %386 = vadd.xlane.f32.xlu0 %v350_v34  ;;  %v295_v63 = vmul.f32 %v263_v58, %v231_v57  ;;  %v356_v0 = vmul.f32 %v324_v59, %v292_v56  ;;  %v327_v1 = vld [vmem:[%s632_s24 + $0x68] sm:$0xff]  ;;  %v265_v4 = vld [vmem:[%s626_s21 + $0x78] sm:$0xff]  ;;  %v232_v6 = vld [vmem:[%s620_s18 + $0x70] sm:$0xff] }
  0x1f   : > { %v264_v7 = vld [vmem:[%s626_s21 + $0x70] sm:$0xff]  ;;  %v297_v9 = vmul.f32 %v265_v4, %v233_v3  ;;  %v358_v10 = vmul.f32 %v326_v5, %v294_v2  ;;  %v329_v11 = vld [vmem:[%s632_s24 + $0x78] sm:$0xff]  ;;  %v235_v13 = vld [vmem:[%s620_s18 + $0x88] sm:$0xff] }
  0x20   : > { %v359_v8 = vmul.f32 %v327_v1, %v295_v63  ;;  %v296_v12 = vmul.f32 %v264_v7, %v232_v6  ;;  %v267_v14 = vld [vmem:[%s626_s21 + $0x88] sm:$0xff]  ;;  %v328_v15 = vld [vmem:[%s632_s24 + $0x70] sm:$0xff]  ;;  %v234_v16 = vld [vmem:[%s620_s18 + $0x80] sm:$0xff] }
  0x21   : > { %v266_v17 = vld [vmem:[%s626_s21 + $0x80] sm:$0xff]  ;;  %v361_v18 = vmul.f32 %v329_v11, %v297_v9  ;;  %v299_v19 = vmul.f32 %v267_v14, %v235_v13  ;;  %v331_v21 = vld [vmem:[%s632_s24 + $0x88] sm:$0xff]  ;;  %v237_v23 = vld [vmem:[%s620_s18 + $0x98] sm:$0xff] }
  0x22   : > { %392 = vadd.xlane.f32.xlu1 %v353_v42  ;;  %390 = vadd.xlane.f32.xlu0 %v352_v44  ;;  %v360_v20 = vmul.f32 %v328_v15, %v296_v12  ;;  %v298_v22 = vmul.f32 %v266_v17, %v234_v16  ;;  %v269_v24 = vld [vmem:[%s626_s21 + $0x98] sm:$0xff]  ;;  %v330_v25 = vld [vmem:[%s632_s24 + $0x80] sm:$0xff]  ;;  %v236_v26 = vld [vmem:[%s620_s18 + $0x90] sm:$0xff] }
  0x23   : > { %v268_v27 = vld [vmem:[%s626_s21 + $0x90] sm:$0xff]  ;;  %v363_v28 = vmul.f32 %v331_v21, %v299_v19  ;;  %v301_v29 = vmul.f32 %v269_v24, %v237_v23  ;;  %v333_v31 = vld [vmem:[%s632_s24 + $0x98] sm:$0xff]  ;;  %v239_v33 = vld [vmem:[%s620_s18 + $0xa8] sm:$0xff] }
  0x24   : > { %v362_v30 = vmul.f32 %v330_v25, %v298_v22  ;;  %v300_v32 = vmul.f32 %v268_v27, %v236_v26  ;;  %v271_v34 = vld [vmem:[%s626_s21 + $0xa8] sm:$0xff]  ;;  %v332_v35 = vld [vmem:[%s632_s24 + $0x90] sm:$0xff]  ;;  %v238_v36 = vld [vmem:[%s620_s18 + $0xa0] sm:$0xff] }
  0x25   : > { %v270_v37 = vld [vmem:[%s626_s21 + $0xa0] sm:$0xff]  ;;  %v365_v38 = vmul.f32 %v333_v31, %v301_v29  ;;  %v303_v39 = vmul.f32 %v271_v34, %v239_v33  ;;  %v335_v41 = vld [vmem:[%s632_s24 + $0xa8] sm:$0xff]  ;;  %v241_v43 = vld [vmem:[%s620_s18 + $0xb8] sm:$0xff] }
  0x26   : > { %396 = vadd.xlane.f32.xlu1 %v355_v52  ;;  %394 = vadd.xlane.f32.xlu0 %v354_v54  ;;  %v364_v40 = vmul.f32 %v332_v35, %v300_v32  ;;  %v302_v42 = vmul.f32 %v270_v37, %v238_v36  ;;  %v273_v44 = vld [vmem:[%s626_s21 + $0xb8] sm:$0xff]  ;;  %v334_v45 = vld [vmem:[%s632_s24 + $0xa0] sm:$0xff]  ;;  %v240_v46 = vld [vmem:[%s620_s18 + $0xb0] sm:$0xff] }
  0x27   : > { %v272_v47 = vld [vmem:[%s626_s21 + $0xb0] sm:$0xff]  ;;  %v367_v48 = vmul.f32 %v335_v41, %v303_v39  ;;  %v305_v49 = vmul.f32 %v273_v44, %v241_v43  ;;  %v337_v51 = vld [vmem:[%s632_s24 + $0xb8] sm:$0xff]  ;;  %v243_v53 = vld [vmem:[%s620_s18 + $0xc8] sm:$0xff] }
  0x28   : > { %v366_v50 = vmul.f32 %v334_v45, %v302_v42  ;;  %v304_v52 = vmul.f32 %v272_v47, %v240_v46  ;;  %v275_v54 = vld [vmem:[%s626_s21 + $0xc8] sm:$0xff]  ;;  %v336_v55 = vld [vmem:[%s632_s24 + $0xb0] sm:$0xff]  ;;  %v242_v56 = vld [vmem:[%s620_s18 + $0xc0] sm:$0xff] }
  0x29   : > { %v274_v57 = vld [vmem:[%s626_s21 + $0xc0] sm:$0xff]  ;;  %v369_v58 = vmul.f32 %v337_v51, %v305_v49  ;;  %v307_v59 = vmul.f32 %v275_v54, %v243_v53  ;;  %v339_v61 = vld [vmem:[%s632_s24 + $0xc8] sm:$0xff]  ;;  %v245_v63 = vld [vmem:[%s620_s18 + $0xd8] sm:$0xff] }
  0x2a   : > { %400 = vadd.xlane.f32.xlu1 %v357_v62  ;;  %398 = vadd.xlane.f32.xlu0 %v356_v0  ;;  %v368_v60 = vmul.f32 %v336_v55, %v304_v52  ;;  %v306_v62 = vmul.f32 %v274_v57, %v242_v56  ;;  %v277_v0 = vld [vmem:[%s626_s21 + $0xd8] sm:$0xff]  ;;  %v338_v1 = vld [vmem:[%s632_s24 + $0xc0] sm:$0xff]  ;;  %v244_v2 = vld [vmem:[%s620_s18 + $0xd0] sm:$0xff] }
  0x2b   : > { %v276_v3 = vld [vmem:[%s626_s21 + $0xd0] sm:$0xff]  ;;  %v371_v4 = vmul.f32 %v339_v61, %v307_v59  ;;  %v309_v5 = vmul.f32 %v277_v0, %v245_v63  ;;  %v341_v7 = vld [vmem:[%s632_s24 + $0xd8] sm:$0xff]  ;;  %v247_v9 = vld [vmem:[%s620_s18 + $0xe8] sm:$0xff] }
  0x2c   : > { %v370_v6 = vmul.f32 %v338_v1, %v306_v62  ;;  %v340_v11 = vld [vmem:[%s632_s24 + $0xd0] sm:$0xff]  ;;  %v246_v12 = vld [vmem:[%s620_s18 + $0xe0] sm:$0xff]  ;;  %v343_v17 = vld [vmem:[%s632_s24 + $0xe8] sm:$0xff] }
  0x2d   : > { %v278_v13 = vld [vmem:[%s626_s21 + $0xe0] sm:$0xff]  ;;  %v373_v14 = vmul.f32 %v341_v7, %v309_v5  ;;  %v249_v19 = vld [vmem:[%s620_s18 + $0xf8] sm:$0xff]  ;;  %v248_v22 = vld [vmem:[%s620_s18 + $0xf0] sm:$0xff] }
  0x2e   : > { %404 = vadd.xlane.f32.xlu1 %v359_v8  ;;  %402 = vadd.xlane.f32.xlu0 %v358_v10  ;;  %v308_v8 = vmul.f32 %v276_v3, %v244_v2  ;;  %v279_v10 = vld [vmem:[%s626_s21 + $0xe8] sm:$0xff]  ;;  %v342_v21 = vld [vmem:[%s632_s24 + $0xe0] sm:$0xff]  ;;  %v280_v23 = vld [vmem:[%s626_s21 + $0xf0] sm:$0xff] }
  0x2f   : > { %v311_v15 = vmul.f32 %v279_v10, %v247_v9  ;;  %v345_v27 = vld [vmem:[%s632_s24 + $0xf8] sm:$0xff]  ;;  %v344_v29 = vld [vmem:[%s632_s24 + $0xf0] sm:$0xff] }
  0x30   : > { %v372_v16 = vmul.f32 %v340_v11, %v308_v8 }
  0x31   : > { %v375_v24 = vmul.f32 %v343_v17, %v311_v15 }
  0x32   : > { %408 = vadd.xlane.f32.xlu1 %v361_v18  ;;  %406 = vadd.xlane.f32.xlu0 %v360_v20  ;;  %v310_v18 = vmul.f32 %v278_v13, %v246_v12  ;;  %v281_v20 = vld [vmem:[%s626_s21 + $0xf8] sm:$0xff] }
  0x33   : > { %v313_v25 = vmul.f32 %v281_v20, %v249_v19 }
  0x34   : > { %v374_v26 = vmul.f32 %v342_v21, %v310_v18 }
  0x36   : > { %412 = vadd.xlane.f32.xlu1 %v363_v28  ;;  %410 = vadd.xlane.f32.xlu0 %v362_v30  ;;  %v312_v28 = vmul.f32 %v280_v23, %v248_v22  ;;  %v377_v30 = vmul.f32 %v345_v27, %v313_v25 }
  0x38   : > { %v376_v31 = vmul.f32 %v344_v29, %v312_v28 }
  0x3a   : > { %416 = vadd.xlane.f32.xlu1 %v365_v38  ;;  %414 = vadd.xlane.f32.xlu0 %v364_v40 }
  0x3e   : > { %420 = vadd.xlane.f32.xlu1 %v367_v48  ;;  %418 = vadd.xlane.f32.xlu0 %v366_v50 }
  0x42   : > { %424 = vadd.xlane.f32.xlu1 %v369_v58  ;;  %422 = vadd.xlane.f32.xlu0 %v368_v60 }
  0x46   : > { %428 = vadd.xlane.f32.xlu1 %v371_v4  ;;  %426 = vadd.xlane.f32.xlu0 %v370_v6 }
  0x4a   : > { %432 = vadd.xlane.f32.xlu1 %v373_v14  ;;  %430 = vadd.xlane.f32.xlu0 %v372_v16 }
  0x4e   : > { %436 = vadd.xlane.f32.xlu1 %v375_v24  ;;  %434 = vadd.xlane.f32.xlu0 %v374_v26 }
  0x52   : > { %440 = vadd.xlane.f32.xlu1 %v377_v30  ;;  %438 = vadd.xlane.f32.xlu0 %v376_v31 }
  0xa3   : > { %v383_v32 = vpop.xlane.xlu1 %382  ;;  %v379_v33 = vpop.xlane.xlu0 %378 }
  0xa4   : > { %445 = vst.msk [vmem:[%s734_s27 + $0x10] sm:$0xff] %vm442_vm0, %v383_v32  ;;  %443 = vst.msk [vmem:[%s734_s27] sm:$0xff] %vm442_vm0, %v379_v33 }
  0xa7   : > { %v385_v34 = vpop.xlane.xlu1 %384  ;;  %v381_v35 = vpop.xlane.xlu0 %380 }
  0xa8   : > { %446 = vst.msk [vmem:[%s734_s27 + $0x18] sm:$0xff] %vm442_vm0, %v385_v34  ;;  %444 = vst.msk [vmem:[%s734_s27 + $0x8] sm:$0xff] %vm442_vm0, %v381_v35 }
  0xab   : > { %v389_v36 = vpop.xlane.xlu1 %388  ;;  %v387_v37 = vpop.xlane.xlu0 %386 }
  0xac   : > { %448 = vst.msk [vmem:[%s734_s27 + $0x28] sm:$0xff] %vm442_vm0, %v389_v36  ;;  %447 = vst.msk [vmem:[%s734_s27 + $0x20] sm:$0xff] %vm442_vm0, %v387_v37 }
  0xaf   : > { %v393_v38 = vpop.xlane.xlu1 %392  ;;  %v391_v39 = vpop.xlane.xlu0 %390 }
  0xb0   : > { %450 = vst.msk [vmem:[%s734_s27 + $0x38] sm:$0xff] %vm442_vm0, %v393_v38  ;;  %449 = vst.msk [vmem:[%s734_s27 + $0x30] sm:$0xff] %vm442_vm0, %v391_v39 }
  0xb3   : > { %v397_v40 = vpop.xlane.xlu1 %396  ;;  %v395_v41 = vpop.xlane.xlu0 %394 }
  0xb4   : > { %452 = vst.msk [vmem:[%s734_s27 + $0x48] sm:$0xff] %vm442_vm0, %v397_v40  ;;  %451 = vst.msk [vmem:[%s734_s27 + $0x40] sm:$0xff] %vm442_vm0, %v395_v41 }
  0xb7   : > { %v401_v42 = vpop.xlane.xlu1 %400  ;;  %v399_v43 = vpop.xlane.xlu0 %398 }
  0xb8   : > { %454 = vst.msk [vmem:[%s734_s27 + $0x58] sm:$0xff] %vm442_vm0, %v401_v42  ;;  %453 = vst.msk [vmem:[%s734_s27 + $0x50] sm:$0xff] %vm442_vm0, %v399_v43 }
  0xbb   : > { %v405_v44 = vpop.xlane.xlu1 %404  ;;  %v403_v45 = vpop.xlane.xlu0 %402 }
  0xbc   : > { %456 = vst.msk [vmem:[%s734_s27 + $0x68] sm:$0xff] %vm442_vm0, %v405_v44  ;;  %455 = vst.msk [vmem:[%s734_s27 + $0x60] sm:$0xff] %vm442_vm0, %v403_v45 }
  0xbf   : > { %v409_v46 = vpop.xlane.xlu1 %408  ;;  %v407_v47 = vpop.xlane.xlu0 %406 }
  0xc0   : > { %458 = vst.msk [vmem:[%s734_s27 + $0x78] sm:$0xff] %vm442_vm0, %v409_v46  ;;  %457 = vst.msk [vmem:[%s734_s27 + $0x70] sm:$0xff] %vm442_vm0, %v407_v47 }
  0xc3   : > { %v413_v48 = vpop.xlane.xlu1 %412  ;;  %v411_v49 = vpop.xlane.xlu0 %410 }
  0xc4   : > { %460 = vst.msk [vmem:[%s734_s27 + $0x88] sm:$0xff] %vm442_vm0, %v413_v48  ;;  %459 = vst.msk [vmem:[%s734_s27 + $0x80] sm:$0xff] %vm442_vm0, %v411_v49 }
  0xc7   : > { %v417_v50 = vpop.xlane.xlu1 %416  ;;  %v415_v51 = vpop.xlane.xlu0 %414 }
  0xc8   : > { %462 = vst.msk [vmem:[%s734_s27 + $0x98] sm:$0xff] %vm442_vm0, %v417_v50  ;;  %461 = vst.msk [vmem:[%s734_s27 + $0x90] sm:$0xff] %vm442_vm0, %v415_v51 }
  0xcb   : > { %v421_v52 = vpop.xlane.xlu1 %420  ;;  %v419_v53 = vpop.xlane.xlu0 %418 }
  0xcc   : > { %464 = vst.msk [vmem:[%s734_s27 + $0xa8] sm:$0xff] %vm442_vm0, %v421_v52  ;;  %463 = vst.msk [vmem:[%s734_s27 + $0xa0] sm:$0xff] %vm442_vm0, %v419_v53 }
  0xcf   : > { %v425_v54 = vpop.xlane.xlu1 %424  ;;  %v423_v55 = vpop.xlane.xlu0 %422 }
  0xd0   : > { %466 = vst.msk [vmem:[%s734_s27 + $0xb8] sm:$0xff] %vm442_vm0, %v425_v54  ;;  %465 = vst.msk [vmem:[%s734_s27 + $0xb0] sm:$0xff] %vm442_vm0, %v423_v55 }
  0xd3   : > { %v429_v56 = vpop.xlane.xlu1 %428  ;;  %v427_v57 = vpop.xlane.xlu0 %426 }
  0xd4   : > { %468 = vst.msk [vmem:[%s734_s27 + $0xc8] sm:$0xff] %vm442_vm0, %v429_v56  ;;  %467 = vst.msk [vmem:[%s734_s27 + $0xc0] sm:$0xff] %vm442_vm0, %v427_v57 }
  0xd7   : > { %v433_v58 = vpop.xlane.xlu1 %432  ;;  %v431_v59 = vpop.xlane.xlu0 %430 }
  0xd8   : > { %470 = vst.msk [vmem:[%s734_s27 + $0xd8] sm:$0xff] %vm442_vm0, %v433_v58  ;;  %469 = vst.msk [vmem:[%s734_s27 + $0xd0] sm:$0xff] %vm442_vm0, %v431_v59 }
  0xdb   : > { %v437_v60 = vpop.xlane.xlu1 %436  ;;  %v435_v61 = vpop.xlane.xlu0 %434 }
  0xdc   : > { %472 = vst.msk [vmem:[%s734_s27 + $0xe8] sm:$0xff] %vm442_vm0, %v437_v60  ;;  %471 = vst.msk [vmem:[%s734_s27 + $0xe0] sm:$0xff] %vm442_vm0, %v435_v61 }
  0xdf   : > { %v441_v62 = vpop.xlane.xlu1 %440  ;;  %v439_v63 = vpop.xlane.xlu0 %438 }
  0xe0   : > { %474 = vst.msk [vmem:[%s734_s27 + $0xf8] sm:$0xff] %vm442_vm0, %v441_v62  ;;  %473 = vst.msk [vmem:[%s734_s27 + $0xf0] sm:$0xff] %vm442_vm0, %v439_v63 }
  0xe1 PF: > { %s13_s12 = sadd.s32 1, %s584_s12  }
  0xe2   : > { %p10_p4 = scmp.ge.s32.totalorder %s13_s12, 4  }
  0xe4   :  { %12 = sbr.rel (!%p10_p4) target bundleno = 1 (0x1), region = 68 }

</bundles_post_ra>
